<compile_context>
chip_gen: v6e
topology: v6e:2x2x1
jax: 0.10.0
libtpu: 0.0.40
codegen_flags: <defaults>
</compile_context>

<pallas_src>
import functools
import math

import jax
import jax.numpy as jnp
from jax.experimental import pallas as pl
from jax.experimental.pallas import tpu as pltpu


def _pair(x):
    if isinstance(x, (tuple, list)):
        return tuple(x)
    return (x, x)


def _round_up(x, m):
    return ((x + m - 1) // m) * m


# ==========================================================================
# Path 1: depthwise conv (groups == Cin == Cout) — VPU kernel, NHWC layout,
# channels on the lane axis, taps as fused multiply-adds.
# ==========================================================================
def _depthwise_kernel(x_ref, w_ref, b_ref, o_ref, *, kh, kw, sh, sw, dh, dw):
    # x_ref: (sh*sw, Hq, Wq, C) phase-decomposed padded input of one image.
    # w_ref: (kh*kw, C).  b_ref: (1, C).  o_ref: (OH, OW, C).
    OH, OW, C = o_ref.shape
    acc = None
    for i in range(kh):
        for j in range(kw):
            ri, qi = (i * dh) % sh, (i * dh) // sh
            rj, qj = (j * dw) % sw, (j * dw) // sw
            p = ri * sw + rj
            # Contiguous static slice of the VMEM block (no strided loads).
            x_tap = x_ref[p, qi:qi + OH, qj:qj + OW, :].astype(jnp.float32)
            w_tap = w_ref[i * kw + j:i * kw + j + 1, :].astype(jnp.float32)
            term = x_tap * w_tap          # lane-broadcast over (OH, OW)
            acc = term if acc is None else acc + term
    acc = acc + b_ref[...].astype(jnp.float32)   # fused bias
    o_ref[...] = acc.astype(o_ref.dtype)


def _depthwise_vmem_bytes(x_shape, kernel_size, stride, padding, dilation):
    """Estimate the double-buffered VMEM working set of the depthwise path."""
    N, C, H, W = x_shape
    kh, kw = kernel_size
    sh, sw = stride
    ph, pw = padding
    dh, dw = dilation
    Hp, Wp = H + 2 * ph, W + 2 * pw
    Hq, Wq = -(-Hp // sh), -(-Wp // sw)
    OH = (Hp - (dh * (kh - 1) + 1)) // sh + 1
    OW = (Wp - (dw * (kw - 1) + 1)) // sw + 1
    return 4 * 2 * (sh * sw * Hq * Wq * C + OH * OW * C)


def _depthwise_conv(x, weight, bias, stride, padding, dilation, out_dtype):
    """Pure depthwise conv.  x: (N, C, H, W); weight: (C, 1, kh, kw)."""
    N, C, H, W = x.shape
    kh, kw = weight.shape[2], weight.shape[3]
    sh, sw = stride
    ph, pw = padding
    dh, dw = dilation

    Hp, Wp = H + 2 * ph, W + 2 * pw
    OH = (Hp - (dh * (kh - 1) + 1)) // sh + 1
    OW = (Wp - (dw * (kw - 1) + 1)) // sw + 1
    Hq, Wq = -(-Hp // sh), -(-Wp // sw)      # rows/cols per stride phase

    # NCHW -> NHWC (channels on lanes), zero-pad spatially, then decompose
    # by stride phase so every in-kernel tap slice is contiguous.
    xt = jnp.transpose(x, (0, 2, 3, 1))
    xp = jnp.pad(xt, ((0, 0),
                      (ph, ph + Hq * sh - Hp),
                      (pw, pw + Wq * sw - Wp),
                      (0, 0)))
    xph = xp.reshape(N, Hq, sh, Wq, sw, C)
    xph = jnp.transpose(xph, (0, 2, 4, 1, 3, 5)).reshape(N, sh * sw, Hq, Wq, C)

    w = weight.reshape(C, kh * kw).T.astype(jnp.float32)          # (kh*kw, C)
    b = bias if bias is not None else jnp.zeros((C,), jnp.float32)
    b = b.reshape(1, C).astype(jnp.float32)

    kernel = functools.partial(_depthwise_kernel, kh=kh, kw=kw,
                               sh=sh, sw=sw, dh=dh, dw=dw)

    out = pl.pallas_call(
        kernel,
        out_shape=jax.ShapeDtypeStruct((N, OH, OW, C), out_dtype),
        grid_spec=pltpu.PrefetchScalarGridSpec(
            num_scalar_prefetch=0,
            grid=(N,),      # one padded image per grid step
            in_specs=[
                pl.BlockSpec((None, sh * sw, Hq, Wq, C),
                             lambda n: (n, 0, 0, 0, 0)),
                pl.BlockSpec((kh * kw, C), lambda n: (0, 0)),
                pl.BlockSpec((1, C), lambda n: (0, 0)),
            ],
            out_specs=pl.BlockSpec((None, OH, OW, C), lambda n: (n, 0, 0, 0)),
        ),
        compiler_params=pltpu.CompilerParams(
            dimension_semantics=("parallel",)),
    )(xph, w, b)

    return jnp.transpose(out, (0, 3, 1, 2))   # back to NCHW


# ==========================================================================
# Path 2: grouped GEMM on the MXU (pointwise / dense / generic grouped).
# grid = (G, M/tm, N/tn[, K/tk]); reduction axis (if any) is last.
# ==========================================================================
def _gemm_kernel_single_k(a_ref, b_ref, bias_ref, o_ref):
    prod = jnp.dot(a_ref[...], b_ref[...], preferred_element_type=jnp.float32)
    o_ref[...] = (prod + bias_ref[...].astype(jnp.float32)).astype(o_ref.dtype)


def _gemm_kernel_multi_k(a_ref, b_ref, bias_ref, o_ref, acc_ref):
    k = pl.program_id(3)
    prod = jnp.dot(a_ref[...], b_ref[...], preferred_element_type=jnp.float32)

    @pl.when(k == 0)
    def _():                       # no zero-fill pass: write first product
        acc_ref[...] = prod

    @pl.when(k > 0)
    def _():
        acc_ref[...] += prod

    @pl.when(k == pl.num_programs(3) - 1)
    def _():                       # fused bias add + downcast on finalize
        o_ref[...] = (acc_ref[...] + bias_ref[...].astype(jnp.float32)
                      ).astype(o_ref.dtype)


def _grouped_matmul(a, b, bias, out_dtype, *, use_bf16=True):
    """a: (G, M, K) @ b: (G, K, N) + bias (G, N) -> (G, M, N)."""
    G, M, K = a.shape
    _, _, N = b.shape

    M_pad = _round_up(M, 128)
    K_pad = _round_up(K, 128)
    N_pad = _round_up(N, 128)

    # MXU is natively bf16 on v5e/v6e/v7x; keep the f32 accumulator.
    op_dtype = jnp.bfloat16 if (use_bf16 and a.dtype == jnp.float32) else a.dtype
    op_bytes = jnp.dtype(op_dtype).itemsize
    out_bytes = jnp.dtype(out_dtype).itemsize

    # --- tile selection ---------------------------------------------------
    # N: lane-dense, and collapse the N grid axis when Cout_g fits so the big
    # patches tensor streams from HBM exactly once.
    if N_pad <= 512:
        tn = N_pad
    elif N_pad % 512 == 0:
        tn = 512
    elif N_pad % 256 == 0:
        tn = 256
    else:
        tn = 128
    # K: single reduction step whenever it fits (skips the scratch entirely).
    if K_pad <= 512:
        tk = K_pad
    elif K_pad % 512 == 0:
        tk = 512
    elif K_pad % 256 == 0:
        tk = 256
    else:
        tk = 128
    # M: largest tile dividing M_pad (avoids the padded-output copy when M is
    # already a multiple of 128, which it usually is).
    tm_cands = [1024, 512, 256, 128] if M_pad >= 4096 else [512, 256, 128]
    tm = next(c for c in tm_cands if M_pad % c == 0)

    # v7x megacore: make sure the parallel grid axes have >= 2 steps.
    if G * (M_pad // tm) * (N_pad // tn) < 2 and tm > 128:
        tm //= 2

    # Double-buffered VMEM working set; budget against the 16 MiB v5e scoped
    # default (v6e/v7x default 32 MiB; v7x has 64 MiB physical per TC).
    def _vmem_bytes(tm_):
        return (2 * tm_ * tk * op_bytes + 2 * tk * tn * op_bytes
                + 2 * tm_ * tn * out_bytes + tm_ * tn * 4 + 2 * tn * 4)
    while _vmem_bytes(tm) > 12 * 1024 * 1024 and tm > 128:
        tm //= 2

    # --- pad / cast ---------------------------------------------------------
    if (M_pad, K_pad) != (M, K):
        a = jnp.pad(a, ((0, 0), (0, M_pad - M), (0, K_pad - K)))
    if (K_pad, N_pad) != (K, N):
        b = jnp.pad(b, ((0, 0), (0, K_pad - K), (0, N_pad - N)))
    a = a.astype(op_dtype)
    b = b.astype(op_dtype)

    if bias is None:
        bias_p = jnp.zeros((G, 1, N_pad), jnp.float32)
    else:
        bias_p = jnp.pad(bias.astype(jnp.float32), ((0, 0), (0, N_pad - N)))
        bias_p = bias_p.reshape(G, 1, N_pad)

    n_k = K_pad // tk
    if n_k == 1:
        grid = (G, M_pad // tm, N_pad // tn)
        in_specs = [
            pl.BlockSpec((None, tm, tk), lambda g, i, j: (g, i, 0)),
            pl.BlockSpec((None, tk, tn), lambda g, i, j: (g, 0, j)),
            pl.BlockSpec((None, 1, tn), lambda g, i, j: (g, 0, j)),
        ]
        out_specs = pl.BlockSpec((None, tm, tn), lambda g, i, j: (g, i, j))
        kernel = _gemm_kernel_single_k
        scratch = []
        sem = ("parallel", "parallel", "parallel")
    else:
        grid = (G, M_pad // tm, N_pad // tn, n_k)
        in_specs = [
            pl.BlockSpec((None, tm, tk), lambda g, i, j, k: (g, i, k)),
            pl.BlockSpec((None, tk, tn), lambda g, i, j, k: (g, k, j)),
            pl.BlockSpec((None, 1, tn), lambda g, i, j, k: (g, 0, j)),
        ]
        out_specs = pl.BlockSpec((None, tm, tn), lambda g, i, j, k: (g, i, j))
        kernel = _gemm_kernel_multi_k
        scratch = [pltpu.VMEM((tm, tn), jnp.float32)]
        sem = ("parallel", "parallel", "parallel", "arbitrary")

    out = pl.pallas_call(
        kernel,
        out_shape=jax.ShapeDtypeStruct((G, M_pad, N_pad), out_dtype),
        grid_spec=pltpu.PrefetchScalarGridSpec(
            num_scalar_prefetch=0,
            grid=grid,
            in_specs=in_specs,
            out_specs=out_specs,
            scratch_shapes=scratch,
        ),
        compiler_params=pltpu.CompilerParams(dimension_semantics=sem),
    )(a, b, bias_p)

    if (M_pad, N_pad) != (M, N):
        out = out[:, :M, :N]
    return out


# --------------------------------------------------------------------------
# im2col (wrapper-side): (N, C, H, W) -> (G, N*OH*OW, (C/G)*KH*KW).
# Feature ordering matches torch's weight.reshape(Cout, Cin_g*KH*KW):
# index = c_in * (KH*KW) + kh * KW + kw.  For 1x1 convs this is a pure
# reshape/transpose (no read amplification).
# --------------------------------------------------------------------------
def _im2col_grouped(x, kernel_size, stride, padding, dilation, groups):
    N, C, H, W = x.shape
    kh, kw = kernel_size
    sh, sw = stride
    ph, pw = padding
    dh, dw = dilation
    cg = C // groups

    xp = jnp.pad(x, ((0, 0), (0, 0), (ph, ph), (pw, pw)))
    Hp, Wp = H + 2 * ph, W + 2 * pw
    eff_kh = dh * (kh - 1) + 1
    eff_kw = dw * (kw - 1) + 1
    OH = (Hp - eff_kh) // sh + 1
    OW = (Wp - eff_kw) // sw + 1

    cols = []
    for i in range(kh):
        for j in range(kw):
            cols.append(xp[:, :,
                           i * dh: i * dh + sh * (OH - 1) + 1: sh,
                           j * dw: j * dw + sw * (OW - 1) + 1: sw])
    col = jnp.stack(cols, axis=2)                 # (N, C, KH*KW, OH, OW)
    col = jnp.transpose(col, (0, 3, 4, 1, 2))     # (N, OH, OW, C, KH*KW)
    col = col.reshape(N, OH, OW, groups, cg, kh * kw)
    col = jnp.transpose(col, (3, 0, 1, 2, 4, 5))  # (G, N, OH, OW, cg, KH*KW)
    col = col.reshape(groups, N * OH * OW, cg * kh * kw)
    return col, OH, OW


class MaskedConv2dMobileNet:
    """JAX/Pallas port of the PyTorch MaskedConv2d_MobileNet module (forward)."""

    def __init__(self, in_channels, out_channels, kernel_size, stride=1,
                 padding=0, dilation=1, groups=1, bias=False, *,
                 key=None, dtype=jnp.float32, use_bf16_matmul=True):
        assert in_channels % groups == 0 and out_channels % groups == 0
        self.in_channels = in_channels
        self.out_channels = out_channels
        self.kernel_size = _pair(kernel_size)
        self.stride = _pair(stride)
        self.padding = _pair(padding)
        self.dilation = _pair(dilation)
        self.groups = groups
        self.use_bf16_matmul = use_bf16_matmul

        kh, kw = self.kernel_size
        if key is None:
            key = jax.random.PRNGKey(0)
        wkey, bkey = jax.random.split(key)
        fan_in = (in_channels // groups) * kh * kw
        bound = 1.0 / math.sqrt(fan_in)   # kaiming_uniform_ with a=sqrt(5)
        self.weight_prune = jax.random.uniform(
            wkey, (out_channels, in_channels // groups, kh, kw),
            dtype, -bound, bound)
        # mask exists as a parameter but is NOT applied in forward (matches torch).
        self.mask = jnp.ones_like(self.weight_prune)
        self.bias = (jax.random.uniform(bkey, (out_channels,), dtype,
                                        -bound, bound) if bias else None)
        # TODO(synk): prune / prune_filters / mask_on_input_channels are
        # host-side numpy weight-editing utilities, not part of forward.

    def __call__(self, x):
        N, C, H, W = x.shape
        assert C == self.in_channels
        G = self.groups
        kh, kw = self.kernel_size
        cout_g = self.out_channels // G

        # ---- depthwise fast path (MobileNet's dominant conv type) --------
        is_depthwise = (G == C and self.out_channels == C and G > 1)
        if is_depthwise and _depthwise_vmem_bytes(
                x.shape, self.kernel_size, self.stride, self.padding,
                self.dilation) < 12 * 1024 * 1024:
            return _depthwise_conv(x, self.weight_prune.astype(x.dtype),
                                   self.bias, self.stride, self.padding,
                                   self.dilation, x.dtype)
        # TODO(synk): depthwise images too large for whole-image VMEM blocks
        # fall back to the grouped GEMM below; a row/channel-tiled depthwise
        # kernel would be the proper fix.

        # ---- general path: im2col + grouped MXU GEMM (fused bias) --------
        patches, OH, OW = _im2col_grouped(
            x, self.kernel_size, self.stride, self.padding, self.dilation, G)
        w = self.weight_prune.reshape(G, cout_g, (C // G) * kh * kw)
        w = jnp.transpose(w, (0, 2, 1)).astype(x.dtype)      # (G, K, Cout_g)
        bias = None if self.bias is None else self.bias.reshape(G, cout_g)

        out = _grouped_matmul(patches.astype(x.dtype), w, bias, x.dtype,
                              use_bf16=self.use_bf16_matmul)  # (G, M, Cout_g)
        out = out.reshape(G, N, OH, OW, cout_g)
        out = jnp.transpose(out, (1, 0, 4, 2, 3)).reshape(
            N, self.out_channels, OH, OW)
        return out


if __name__ == "__main__":
    key = jax.random.PRNGKey(0)
    kx1, kx2, kx3, km1, km2, km3 = jax.random.split(key, 6)

    # Case 1: dense 3x3 stem-style conv (groups=1), exact f32 MXU path.
    x1 = jax.random.normal(kx1, (2, 4, 16, 16), dtype=jnp.float32)
    conv1 = MaskedConv2dMobileNet(4, 8, 3, stride=1, padding=1, groups=1,
                                  bias=False, key=km1, use_bf16_matmul=False)
    y1 = jax.block_until_ready(conv1(x1))
    ref1 = jax.lax.conv_general_dilated(
        x1, conv1.weight_prune, window_strides=(1, 1),
        padding=[(1, 1), (1, 1)], rhs_dilation=(1, 1),
        feature_group_count=1, dimension_numbers=("NCHW", "OIHW", "NCHW"))
    assert y1.shape == ref1.shape and y1.dtype == x1.dtype
    assert jnp.allclose(y1, ref1, atol=1e-3, rtol=1e-3), "mismatch (dense 3x3)"

    # Case 2: depthwise 3x3, stride 2, with bias (MobileNet depthwise block).
    x2 = jax.random.normal(kx2, (2, 8, 16, 16), dtype=jnp.float32)
    conv2 = MaskedConv2dMobileNet(8, 8, 3, stride=2, padding=1, groups=8,
                                  bias=True, key=km2)
    y2 = jax.block_until_ready(conv2(x2))
    ref2 = jax.lax.conv_general_dilated(
        x2, conv2.weight_prune, window_strides=(2, 2),
        padding=[(1, 1), (1, 1)], rhs_dilation=(1, 1),
        feature_group_count=8, dimension_numbers=("NCHW", "OIHW", "NCHW"))
    ref2 = ref2 + conv2.bias.reshape(1, -1, 1, 1)
    assert y2.shape == ref2.shape and y2.dtype == x2.dtype
    assert jnp.allclose(y2, ref2, atol=1e-3, rtol=1e-3), "mismatch (depthwise)"

    # Case 3: pointwise 1x1 with bias, bf16 MXU operands + f32 accumulation,
    # K large enough to exercise the multi-step reduction kernel.
    x3 = jax.random.normal(kx3, (2, 640, 8, 8), dtype=jnp.float32)
    conv3 = MaskedConv2dMobileNet(640, 256, 1, stride=1, padding=0, groups=1,
                                  bias=True, key=km3)   # bf16 matmul (default)
    y3 = jax.block_until_ready(conv3(x3))
    ref3 = jax.lax.conv_general_dilated(
        x3, conv3.weight_prune, window_strides=(1, 1),
        padding=[(0, 0), (0, 0)], rhs_dilation=(1, 1),
        feature_group_count=1, dimension_numbers=("NCHW", "OIHW", "NCHW"))
    ref3 = ref3 + conv3.bias.reshape(1, -1, 1, 1)
    assert y3.shape == ref3.shape and y3.dtype == x3.dtype
    assert jnp.allclose(y3, ref3, atol=5e-2, rtol=5e-2), "mismatch (pointwise bf16)"

    print("KERNEL_OK")
</pallas_src>

<mosaic_0001>
module attributes {stable_mosaic.version = 11 : i64} {
  func.func @_gemm_kernel_single_k(%arg0: i32, %arg1: i32, %arg2: i32, %arg3: memref<1x256x128xf32, #tpu.memory_space<vmem>>, %arg4: memref<1x128x128xf32, #tpu.memory_space<vmem>>, %arg5: memref<1x1x128xf32, #tpu.memory_space<vmem>>, %arg6: memref<1x256x128xf32, #tpu.memory_space<vmem>>) attributes {dimension_semantics = [#tpu.dimension_semantics<parallel>, #tpu.dimension_semantics<parallel>, #tpu.dimension_semantics<parallel>], iteration_bounds = array<i64: 1, 2, 1>, scalar_prefetch = 0 : i64, scratch_operands = 0 : i64, tpu.core_type = #tpu.core_type<tc>, window_params = [{transform_indices = @transform_0, window_bounds = array<i64: 1, 256, 128>}, {transform_indices = @transform_1, window_bounds = array<i64: 1, 128, 128>}, {transform_indices = @transform_2, window_bounds = array<i64: 1, 1, 128>}, {transform_indices = @transform_3, window_bounds = array<i64: 1, 256, 128>}]} {
    %c0 = arith.constant 0 : index
    %c0_0 = arith.constant 0 : index
    %c0_1 = arith.constant 0 : index
    %0 = vector.load %arg3[%c0, %c0_0, %c0_1] : memref<1x256x128xf32, #tpu.memory_space<vmem>>, vector<1x256x128xf32>
    %1 = vector.shape_cast %0 : vector<1x256x128xf32> to vector<256x128xf32>
    %c0_2 = arith.constant 0 : index
    %c0_3 = arith.constant 0 : index
    %c0_4 = arith.constant 0 : index
    %2 = vector.load %arg4[%c0_2, %c0_3, %c0_4] : memref<1x128x128xf32, #tpu.memory_space<vmem>>, vector<1x128x128xf32>
    %3 = vector.shape_cast %2 : vector<1x128x128xf32> to vector<128x128xf32>
    %cst = arith.constant dense<0.000000e+00> : vector<256x128xf32>
    %4 = tpu.matmul %1, %3, %cst {dimension_numbers = #tpu.dot_dimension_numbers<[1], [0], [0], [1], [0, 0, 1, 1], [], []>} : vector<256x128xf32>, vector<128x128xf32>, vector<256x128xf32> -> vector<256x128xf32>
    %c0_5 = arith.constant 0 : index
    %c0_6 = arith.constant 0 : index
    %c0_7 = arith.constant 0 : index
    %5 = vector.load %arg5[%c0_5, %c0_6, %c0_7] : memref<1x1x128xf32, #tpu.memory_space<vmem>>, vector<1x1x128xf32>
    %6 = vector.shape_cast %5 : vector<1x1x128xf32> to vector<1x128xf32>
    %7 = vector.broadcast %6 : vector<1x128xf32> to vector<256x128xf32>
    %8 = arith.addf %4, %7 : vector<256x128xf32>
    %c0_8 = arith.constant 0 : index
    %c0_9 = arith.constant 0 : index
    %c0_10 = arith.constant 0 : index
    %9 = vector.load %arg6[%c0_8, %c0_9, %c0_10] : memref<1x256x128xf32, #tpu.memory_space<vmem>>, vector<1x256x128xf32>
    %10 = vector.shape_cast %9 : vector<1x256x128xf32> to vector<256x128xf32>
    %11 = vector.shape_cast %8 : vector<256x128xf32> to vector<1x256x128xf32>
    tpu.vector_store %arg6[%c0_8, %c0_9, %c0_10], %11 {strides = array<i32>} : memref<1x256x128xf32, #tpu.memory_space<vmem>>, vector<1x256x128xf32>,
    return
  }
  func.func @transform_0(%arg0: i32, %arg1: i32, %arg2: i32) -> (i32, i32, i32) {
    %c0_i32 = arith.constant 0 : i32
    %c0_i32_0 = arith.constant 0 : i32
    return %arg0, %arg1, %c0_i32 : i32, i32, i32
  }
  func.func @transform_1(%arg0: i32, %arg1: i32, %arg2: i32) -> (i32, i32, i32) {
    %c0_i32 = arith.constant 0 : i32
    %c0_i32_0 = arith.constant 0 : i32
    return %arg0, %c0_i32, %arg2 : i32, i32, i32
  }
  func.func @transform_2(%arg0: i32, %arg1: i32, %arg2: i32) -> (i32, i32, i32) {
    %c0_i32 = arith.constant 0 : i32
    %c0_i32_0 = arith.constant 0 : i32
    return %arg0, %c0_i32, %arg2 : i32, i32, i32
  }
  func.func @transform_3(%arg0: i32, %arg1: i32, %arg2: i32) -> (i32, i32, i32) {
    %c0_i32 = arith.constant 0 : i32
    return %arg0, %arg1, %arg2 : i32, i32, i32
  }
}

</mosaic_0001>

<bundles_post_ra>
// kernel: tpu_custom_call.1
= control target key start
LH: loop header
LB: loop body
LE: loop exit
PB: predicated region body
PF: predicated region fallthrough
CT: control target
= control target key end

     0   :  { %8 = vsyncpa [#allocation3], 0  ;;  %s1440_s0 = inlined_call_operand.hbm [shape: f32[1,512,128], index: 0, kind: input, shape index: {}]   ;;  %s1441_s1 = inlined_call_operand.hbm [shape: f32[1,128,128], index: 1, kind: input, shape index: {}]   ;;  %s1442_s2 = inlined_call_operand.vmem [shape: f32[1,1,128], index: 2, kind: input, shape index: {}]   ;;  %s1443_s3 = inlined_call_operand.hbm [shape: f32[1,512,128], index: 3, kind: output, shape index: {}]  }
   0x1   :  { %10 = vsyncpa [#allocation3 + $0x1], 0 }
   0x2   :  { %11 = vsyncpa [#allocation6], 0 }
   0x3   :  { %12 = vsyncpa [#allocation4], 0 }
   0x4   :  { %14 = vsyncpa [#allocation4 + $0x1], 0  ;;  %s1143_s12 = smov 0   ;;  %s1145_s13 = smov 0  }
   0x5   :  { %s1147_s14 = smov 0   ;;  %s1149_s15 = smov 0  }
   0x6   :  { %s1151_s16 = smov 0   ;;  %s1153_s17 = smov 0  }
   0x7 LB: > { %s718_s18 = sadd.s32 4294967295, %s1114_s17   ;;  %s719_s19 = sadd.s32 4294967294, %s1114_s17   ;;  %s1114_s17 = sphi %s1153_s17, %s20_s17   ;;  %s1110_s16 = sphi %s1151_s16, %s1465_s16   ;;  %s1106_s15 = sphi %s1149_s15, %s1464_s15   ;;  %s1102_s14 = sphi %s1147_s14, %s1463_s14   ;;  %s1098_s13 = sphi %s1145_s13, %s1462_s13   ;;  %s1094_s12 = sphi %s1143_s12, %s1461_s12  }
   0x8   : > { %p61_p0 = scmp.ne.s32.totalorder %s1098_s13, %s1094_s12  ;;  %p1177_p1 = scmp.eq.s32.totalorder %s718_s18, 0 }
   0x9   : > { %p1181_p2 = scmp.eq.s32.totalorder %s718_s18, 1  ;;  %p151_p3 = scmp.eq.s32.totalorder %s719_s19, 1 }
   0xa   : > { %p1187_p4 = por %p1177_p1, %p61_p0  ;;  %p720_p5 = scmp.ge.s32.totalorder %s1114_s17, 1 }
   0xb   : > { %p1192_p6 = por %p151_p3, %p61_p0  ;;  %p158_p7 = scmp.lt.s32.totalorder %s1114_s17, 3 }
   0xc   : > { %s1449_s22 = scalar_select %p1187_p4, 1, 0 }
   0xd   : > { %s1450_s23 = scalar_select %p1192_p6, 1, 0 }
   0xe   : > { %p1197_p8 = pnand %p720_p5, %p158_p7  ;;  %s1116_s25 = smov [#allocation5]  }
   0xf   : > { %s174_s26 = sshll.u32 %s1116_s25, 4  ;;  %s35_s28 = sadd.s32 1, %s1110_s16  ;;  %s175_s26 = int_to_ptr.vmem [resolvable:$true] %s174_s26 }
  0x10   : > { %p907_p9 = pneg %p1197_p8  ;;  %s987_s29 = scalar_lea.vmem %s175_s26, 2048 }
  0x11   : > { %p988_p13 = scmp.ne.s32.totalorder %s175_s26, %s987_s29  ;;  %p995_p5 = scmp.lt.s32.totalorder %s175_s26, %s175_s26 }
  0x12   : > { %p1206_p11 = pnand %p907_p9, %p1177_p1  ;;  %p996_p7 = scmp.lt.s32.totalorder %s987_s29, %s987_s29 }
  0x14   : > { %p978_p12 = pneg %p1206_p11  ;;  %p997_p6 = por %p996_p7, %p995_p5 }
  0x16   : > { %p990_p0 = pnand %p988_p13, %p978_p12 }
  0x18   : > { %p991_p3 = pneg %p990_p0 }
  0x1a   : > { %p998_p4 = pnand %p997_p6, %p991_p3 }
  0x1c   : > { %1001 = shalt.err (!%p998_p4)
}
  0x1d   : > { %s1445_s30 = smov 128   ;;  %s1446_s4 = smov 8  }
  0x1e   : > { %910 = dma.hbm_to_vmem [thread:$0]  (!%p1206_p11), %s1441_s1, 2048, %s175_s26, [#allocation6], %s1445_s30, %s1445_s30, %s1446_s4  }
  0x1f   : > { %p37_p4 = scmp.ge.s32.totalorder %s35_s28, 2  ;;  %s48_s7 = sadd.s32 1, %s1102_s14 }
  0x20   : > { %p55_p6 = scmp.ne.s32.totalorder %s1102_s14, %s1098_s13  ;;  %p56_p9 = scmp.eq.s32.totalorder %s1114_s17, 0 }
  0x21   : > { %s1467_s28 = smov (%p37_p4, %s35_s28), 0  ;;  %p920_p0 = scmp.lt.s32.totalorder %s1114_s17, 2 }
  0x22   : > { %p1227_p12 = por %p56_p9, %p55_p6  ;;  %p1233_p13 = por %p1181_p2, %p55_p6 }
  0x23   : > { %s44_s10 = ssub.s32 %s1110_s16, %s1467_s28  ;;  %s197_s11 = sand.u32 1, %s1102_s14  }
  0x24   : > { %p46_p11 = scmp.eq.s32.totalorder %s44_s10, 0  ;;  %s724_s18 = sshll.u32 %s197_s11, 8 }
  0x25   : > { %s737_s25 = sshll.u32 %s1110_s16, 12  ;;  %s201_s5 = scalar_lea.vmem [#allocation2], %s724_s18 }
  0x26   : > { %s1242_s19 = scalar_select %p46_p11, %s1102_s14, %s48_s7  }
  0x27   : > { %s209_s29 = scalar_lea.hbm %s1440_s0, %s737_s25  ;;  %s210_s6 = sshll.u32 %s201_s5, 4  ;;  %s211_s6 = int_to_ptr.vmem [resolvable:$true] %s210_s6 }
  0x28   : > { %p1250_p2 = pnand %p920_p0, %p1227_p12  ;;  %s198_s30 = scalar_lea.sflag [#allocation3], %s197_s11 }
  0x29   : > { %s1015_s10 = scalar_lea.vmem %s211_s6, 4096  ;;  %s1119_s7 = smov [#allocation2]  }
  0x2a   : > { %p1004_p3 = pneg %p1250_p2  ;;  %p1016_p5 = scmp.ne.s32.totalorder %s211_s6, %s1015_s10 }
  0x2b   : > { %s1020_s4 = sshll.u32 %s1119_s7, 4  ;;  %s1021_s4 = int_to_ptr.vmem [resolvable:$false] %s1020_s4 }
  0x2c   : > { %p1018_p7 = pnand %p1016_p5, %p1004_p3  ;;  %s1022_s25 = scalar_lea.vmem %s1021_s4, 8192 }
  0x2d   : > { %p1023_p6 = scmp.lt.s32.totalorder %s211_s6, %s1021_s4  ;;  %p1024_p9 = scmp.lt.s32.totalorder %s1022_s25, %s1015_s10 }
  0x2e   : > { %p1019_p4 = pneg %p1018_p7 }
  0x2f   : > { %p1025_p11 = por %p1024_p9, %p1023_p6 }
  0x31   : > { %p1026_p10 = pnand %p1025_p11, %p1019_p4 }
  0x33   : > { %1029 = shalt.err (!%p1026_p10)
}
  0x34   : > { %s1456_s8 = smov 8   ;;  %s1457_s18 = smov 128  }
  0x35   : > { %914 = dma.hbm_to_vmem [thread:$0]  (!%p1250_p2), %s209_s29, 4096, %s211_s6, %s198_s30, %s1457_s18, %s1457_s18, %s1456_s8  }
  0x36   : > { %222 = sbr.rel (%p1197_p8) target bundleno = 335 (0x14f), region = 32  ;;  %s1264_s11 = sand.u32 (!%p1197_p8), 1, %s1098_s13  }
  0x37   : > { %s728_s4 = sshll.u32 (!%p1197_p8), %s1264_s11, 8  ;;  %s225_s26 = scalar_lea.sflag (!%p1197_p8), [#allocation3], %s1264_s11 }
  0x38   : > { %s1270_s27 = scalar_lea.vmem (!%p1197_p8), [#allocation2], %s728_s4  ;;  %p1458_p10 = scmp.ne.s32.totalorder (!%p1197_p8), %s1449_s22, 0 }
  0x3b   : > { %1081 = dma.done.wait (%p1458_p10), %s225_s26, 4096  }
  0x3c   : > { %1083 = vsyncadd (%p1458_p10), %s225_s26, 4294963200 }
  0x3d   : > { %1085 = dma.done.wait (%p1177_p1), [#allocation6], 2048  }
  0x3e   : > { %1087 = vsyncadd (%p1177_p1), [#allocation6], 4294965248  ;;  %v316_v0 = vld [vmem:[#allocation5 + $0x78] sm:$0xff]  ;;  %v315_v1 = vld [vmem:[#allocation5 + $0x70] sm:$0xff]  ;;  %s1321_s24 = scalar_lea.vmem [#allocation7], %s728_s4  ;;  %s738_s30 = sshll.u32 %s1106_s15, 12 }
  0x3f   : > { %787 = vmatprep.subr.mxu0 %v316_v0  ;;  %867 = vmatprep.subr.mxu1 %v316_v0  ;;  %v314_v2 = vld [vmem:[#allocation5 + $0x68] sm:$0xff]  ;;  %v313_v3 = vld [vmem:[#allocation5 + $0x60] sm:$0xff]  ;;  %v312_v4 = vld [vmem:[#allocation5 + $0x58] sm:$0xff]  ;;  %s598_s29 = sshll.u32 %s1321_s24, 4  ;;  %s1384_s21 = scalar_lea.hbm %s1443_s3, %s738_s30  ;;  %s1386_s29 = int_to_ptr.vmem [resolvable:$true] %s598_s29 }
  0x40   : > { %788 = vmatpush3.msra.mxu0 %v316_v0  ;;  %883 = vmatpush3.msra.mxu1 %v316_v0  ;;  %v311_v5 = vld [vmem:[#allocation5 + $0x50] sm:$0xff]  ;;  %v310_v6 = vld [vmem:[#allocation5 + $0x48] sm:$0xff]  ;;  %v309_v7 = vld [vmem:[#allocation5 + $0x40] sm:$0xff]  ;;  %s582_s15 = scalar_lea.sflag [#allocation4], %s1264_s11  ;;  %s1030_s10 = scalar_lea.vmem %s1386_s29, 4096 }
  0x41   : > { %789 = vmatprep.subr.mxu0 %v315_v1  ;;  %868 = vmatprep.subr.mxu1 %v315_v1  ;;  %v308_v8 = vld [vmem:[#allocation5 + $0x38] sm:$0xff]  ;;  %v307_v9 = vld [vmem:[#allocation5 + $0x30] sm:$0xff]  ;;  %v306_v10 = vld [vmem:[#allocation5 + $0x28] sm:$0xff]  ;;  %p1031_p1 = scmp.ne.s32.totalorder %s1386_s29, %s1030_s10  ;;  %s1120_s7 = smov [#allocation7]  }
  0x42   : > { %790 = vmatpush3.msra.mxu0 %v315_v1  ;;  %884 = vmatpush3.msra.mxu1 %v315_v1  ;;  %v305_v11 = vld [vmem:[#allocation5 + $0x20] sm:$0xff]  ;;  %v304_v12 = vld [vmem:[#allocation5 + $0x18] sm:$0xff]  ;;  %v303_v13 = vld [vmem:[#allocation5 + $0x10] sm:$0xff]  ;;  %s1034_s25 = sshll.u32 %s1120_s7, 4  ;;  %s1035_s25 = int_to_ptr.vmem [resolvable:$false] %s1034_s25 }
  0x43   : > { %791 = vmatprep.subr.mxu0 %v314_v2  ;;  %869 = vmatprep.subr.mxu1 %v314_v2  ;;  %v302_v14 = vld [vmem:[#allocation5 + $0x8] sm:$0xff]  ;;  %v301_v15 = vld [vmem:[#allocation5] sm:$0xff]  ;;  %v271_v20 = vld [vmem:[%s1270_s27 + $0x10] sm:$0xff]  ;;  %p1032_p8 = pnand %p1031_p1, %p1233_p13  ;;  %s1036_s8 = scalar_lea.vmem %s1035_s25, 8192 }
  0x44   : > { %792 = vmatpush3.msra.mxu0 %v314_v2  ;;  %885 = vmatpush3.msra.mxu1 %v314_v2  ;;  %v269_v16 = vld [vmem:[%s1270_s27] sm:$0xff]  ;;  %v270_v18 = vld [vmem:[%s1270_s27 + $0x8] sm:$0xff]  ;;  %v287_v21 = vld [vmem:[%s1270_s27 + $0x90] sm:$0xff]  ;;  %p1037_p0 = scmp.lt.s32.totalorder %s1386_s29, %s1035_s25  ;;  %p1038_p2 = scmp.lt.s32.totalorder %s1036_s8, %s1030_s10 }
  0x45   : > { %793 = vmatprep.subr.mxu0 %v313_v3  ;;  %870 = vmatprep.subr.mxu1 %v313_v3  ;;  %v285_v17 = vld [vmem:[%s1270_s27 + $0x80] sm:$0xff]  ;;  %v286_v19 = vld [vmem:[%s1270_s27 + $0x88] sm:$0xff]  ;;  %v272_v22 = vld [vmem:[%s1270_s27 + $0x18] sm:$0xff]  ;;  %p1033_p12 = pneg %p1032_p8 }
  0x46   : > { %794 = vmatpush3.msra.mxu0 %v313_v3  ;;  %886 = vmatpush3.msra.mxu1 %v313_v3  ;;  %v288_v23 = vld [vmem:[%s1270_s27 + $0x98] sm:$0xff]  ;;  %v273_v24 = vld [vmem:[%s1270_s27 + $0x20] sm:$0xff]  ;;  %v274_v26 = vld [vmem:[%s1270_s27 + $0x28] sm:$0xff]  ;;  %p1039_p3 = por %p1038_p2, %p1037_p0 }
  0x47   : > { %795 = vmatprep.subr.mxu0 %v312_v4  ;;  %871 = vmatprep.subr.mxu1 %v312_v4  ;;  %v289_v25 = vld [vmem:[%s1270_s27 + $0xa0] sm:$0xff]  ;;  %v290_v27 = vld [vmem:[%s1270_s27 + $0xa8] sm:$0xff]  ;;  %v275_v28 = vld [vmem:[%s1270_s27 + $0x30] sm:$0xff] }
  0x48   : > { %796 = vmatpush3.msra.mxu0 %v312_v4  ;;  %887 = vmatpush3.msra.mxu1 %v312_v4  ;;  %v291_v29 = vld [vmem:[%s1270_s27 + $0xb0] sm:$0xff]  ;;  %v276_v30 = vld [vmem:[%s1270_s27 + $0x38] sm:$0xff]  ;;  %v277_v32 = vld [vmem:[%s1270_s27 + $0x40] sm:$0xff]  ;;  %p1040_p5 = pnand %p1039_p3, %p1033_p12 }
  0x49   : > { %797 = vmatprep.subr.mxu0 %v311_v5  ;;  %872 = vmatprep.subr.mxu1 %v311_v5  ;;  %v292_v31 = vld [vmem:[%s1270_s27 + $0xb8] sm:$0xff]  ;;  %v293_v33 = vld [vmem:[%s1270_s27 + $0xc0] sm:$0xff]  ;;  %v278_v34 = vld [vmem:[%s1270_s27 + $0x48] sm:$0xff] }
  0x4a   : > { %798 = vmatpush3.msra.mxu0 %v311_v5  ;;  %888 = vmatpush3.msra.mxu1 %v311_v5  ;;  %v294_v35 = vld [vmem:[%s1270_s27 + $0xc8] sm:$0xff]  ;;  %v279_v36 = vld [vmem:[%s1270_s27 + $0x50] sm:$0xff]  ;;  %v280_v38 = vld [vmem:[%s1270_s27 + $0x58] sm:$0xff] }
  0x4b   : > { %799 = vmatprep.subr.mxu0 %v310_v6  ;;  %873 = vmatprep.subr.mxu1 %v310_v6  ;;  %v295_v37 = vld [vmem:[%s1270_s27 + $0xd0] sm:$0xff]  ;;  %v296_v39 = vld [vmem:[%s1270_s27 + $0xd8] sm:$0xff]  ;;  %v281_v40 = vld [vmem:[%s1270_s27 + $0x60] sm:$0xff] }
  0x4c   : > { %800 = vmatpush3.msra.mxu0 %v310_v6  ;;  %889 = vmatpush3.msra.mxu1 %v310_v6  ;;  %v297_v41 = vld [vmem:[%s1270_s27 + $0xe0] sm:$0xff]  ;;  %v282_v42 = vld [vmem:[%s1270_s27 + $0x68] sm:$0xff]  ;;  %v283_v44 = vld [vmem:[%s1270_s27 + $0x70] sm:$0xff] }
  0x4d   : > { %801 = vmatprep.subr.mxu0 %v309_v7  ;;  %874 = vmatprep.subr.mxu1 %v309_v7  ;;  %v298_v43 = vld [vmem:[%s1270_s27 + $0xe8] sm:$0xff]  ;;  %v299_v45 = vld [vmem:[%s1270_s27 + $0xf0] sm:$0xff]  ;;  %v284_v46 = vld [vmem:[%s1270_s27 + $0x78] sm:$0xff] }
  0x4e   : > { %802 = vmatpush3.msra.mxu0 %v309_v7  ;;  %890 = vmatpush3.msra.mxu1 %v309_v7  ;;  %v300_v47 = vld [vmem:[%s1270_s27 + $0xf8] sm:$0xff]  ;;  %v1315_v48 = vld [vmem:[%s1442_s2] ss:$0 sm:$0xff] }
  0x4f   : > { %803 = vmatprep.subr.mxu0 %v308_v8  ;;  %875 = vmatprep.subr.mxu1 %v308_v8 }
  0x50   : > { %804 = vmatpush3.msra.mxu0 %v308_v8  ;;  %891 = vmatpush3.msra.mxu1 %v308_v8 }
  0x51   : > { %805 = vmatprep.subr.mxu0 %v307_v9  ;;  %876 = vmatprep.subr.mxu1 %v307_v9 }
  0x52   : > { %806 = vmatpush3.msra.mxu0 %v307_v9  ;;  %892 = vmatpush3.msra.mxu1 %v307_v9 }
  0x53   : > { %807 = vmatprep.subr.mxu0 %v306_v10  ;;  %877 = vmatprep.subr.mxu1 %v306_v10 }
  0x54   : > { %808 = vmatpush3.msra.mxu0 %v306_v10  ;;  %893 = vmatpush3.msra.mxu1 %v306_v10 }
  0x55   : > { %809 = vmatprep.subr.mxu0 %v305_v11  ;;  %878 = vmatprep.subr.mxu1 %v305_v11 }
  0x56   : > { %810 = vmatpush3.msra.mxu0 %v305_v11  ;;  %894 = vmatpush3.msra.mxu1 %v305_v11 }
  0x57   : > { %811 = vmatprep.subr.mxu0 %v304_v12  ;;  %879 = vmatprep.subr.mxu1 %v304_v12 }
  0x58   : > { %812 = vmatpush3.msra.mxu0 %v304_v12  ;;  %895 = vmatpush3.msra.mxu1 %v304_v12 }
  0x59   : > { %813 = vmatprep.subr.mxu0 %v303_v13  ;;  %880 = vmatprep.subr.mxu1 %v303_v13 }
  0x5a   : > { %814 = vmatpush3.msra.mxu0 %v303_v13  ;;  %896 = vmatpush3.msra.mxu1 %v303_v13 }
  0x5b   : > { %815 = vmatprep.subr.mxu0 %v302_v14  ;;  %881 = vmatprep.subr.mxu1 %v302_v14 }
  0x5c   : > { %816 = vmatpush3.msra.mxu0 %v302_v14  ;;  %897 = vmatpush3.msra.mxu1 %v302_v14 }
  0x5d   : > { %817 = vmatprep.subr.mxu0 %v301_v15  ;;  %882 = vmatprep.subr.mxu1 %v301_v15 }
  0x5e   : > { %818 = vmatpush3.msra.mxu0 %v301_v15  ;;  %898 = vmatpush3.msra.mxu1 %v301_v15 }
  0x5f   : > { %819 = vmatprep.mubr.f32.mxu0 %v269_v16  ;;  %843 = vmatprep.mubr.f32.mxu1 %v285_v17 }
  0x60   : > { %820 = vmatmul.mubr.f32.vlgmr.msra.gmra.mxu0 %v270_v18  ;;  %844 = vmatmul.mubr.f32.vlgmr.msra.gmra.mxu1 %v286_v19 }
  0x61   : > { %822 = vmatprep.mubr.f32.mxu0 %v271_v20  ;;  %846 = vmatprep.mubr.f32.mxu1 %v287_v21 }
  0x64   : > { %823 = vmatmul.mubr.f32.gmra.mxu0 %v272_v22  ;;  %847 = vmatmul.mubr.f32.gmra.mxu1 %v288_v23 }
  0x65   : > { %825 = vmatprep.mubr.f32.mxu0 %v273_v24  ;;  %849 = vmatprep.mubr.f32.mxu1 %v289_v25 }
  0x68   : > { %826 = vmatmul.mubr.f32.gmra.mxu0 %v274_v26  ;;  %850 = vmatmul.mubr.f32.gmra.mxu1 %v290_v27 }
  0x69   : > { %828 = vmatprep.mubr.f32.mxu0 %v275_v28  ;;  %852 = vmatprep.mubr.f32.mxu1 %v291_v29 }
  0x6c   : > { %829 = vmatmul.mubr.f32.gmra.mxu0 %v276_v30  ;;  %853 = vmatmul.mubr.f32.gmra.mxu1 %v292_v31 }
  0x6d   : > { %831 = vmatprep.mubr.f32.mxu0 %v277_v32  ;;  %855 = vmatprep.mubr.f32.mxu1 %v293_v33 }
  0x70   : > { %832 = vmatmul.mubr.f32.gmra.mxu0 %v278_v34  ;;  %856 = vmatmul.mubr.f32.gmra.mxu1 %v294_v35 }
  0x71   : > { %834 = vmatprep.mubr.f32.mxu0 %v279_v36  ;;  %858 = vmatprep.mubr.f32.mxu1 %v295_v37 }
  0x74   : > { %835 = vmatmul.mubr.f32.gmra.mxu0 %v280_v38  ;;  %859 = vmatmul.mubr.f32.gmra.mxu1 %v296_v39 }
  0x75   : > { %837 = vmatprep.mubr.f32.mxu0 %v281_v40  ;;  %861 = vmatprep.mubr.f32.mxu1 %v297_v41 }
  0x78   : > { %838 = vmatmul.mubr.f32.gmra.mxu0 %v282_v42  ;;  %862 = vmatmul.mubr.f32.gmra.mxu1 %v298_v43 }
  0x79   : > { %840 = vmatprep.mubr.f32.mxu0 %v283_v44  ;;  %864 = vmatprep.mubr.f32.mxu1 %v299_v45 }
  0x7c   : > { %841 = vmatmul.mubr.f32.gmra.mxu0 %v284_v46  ;;  %865 = vmatmul.mubr.f32.gmra.mxu1 %v300_v47 }
 0x120   : > { %v821_v49 = vpop.f32.mrf.mxu0  ;;  %v845_v50 = vpop.f32.mrf.mxu1 }
 0x121   : > { %v396_v51 = vadd.f32 %v821_v49, %v1315_v48  ;;  %v476_v52 = vadd.f32 %v845_v50, %v1315_v48 }
 0x122   : > { %v390_v53 = vpop.f32.mrf.mxu0  ;;  %v470_v54 = vpop.f32.mrf.mxu1 }
 0x123   : > { %550 = vst [vmem:[%s1321_s24 + $0x8] sm:$0xff] %v396_v51  ;;  %566 = vst [vmem:[%s1321_s24 + $0x88] sm:$0xff] %v476_v52  ;;  %v391_v55 = vadd.f32 %v1315_v48, %v390_v53  ;;  %v471_v56 = vadd.f32 %v1315_v48, %v470_v54 }
 0x124   : > { %v824_v57 = vpop.f32.mrf.mxu0  ;;  %v848_v58 = vpop.f32.mrf.mxu1 }
 0x125   : > { %549 = vst [vmem:[%s1321_s24] sm:$0xff] %v391_v55  ;;  %565 = vst [vmem:[%s1321_s24 + $0x80] sm:$0xff] %v471_v56  ;;  %v406_v59 = vadd.f32 %v824_v57, %v1315_v48  ;;  %v486_v60 = vadd.f32 %v848_v58, %v1315_v48 }
 0x126   : > { %v400_v61 = vpop.f32.mrf.mxu0  ;;  %v480_v62 = vpop.f32.mrf.mxu1 }
 0x127   : > { %552 = vst [vmem:[%s1321_s24 + $0x18] sm:$0xff] %v406_v59  ;;  %568 = vst [vmem:[%s1321_s24 + $0x98] sm:$0xff] %v486_v60  ;;  %v401_v63 = vadd.f32 %v1315_v48, %v400_v61  ;;  %v481_v0 = vadd.f32 %v1315_v48, %v480_v62 }
 0x128   : > { %v827_v1 = vpop.f32.mrf.mxu0  ;;  %v851_v2 = vpop.f32.mrf.mxu1 }
 0x129   : > { %551 = vst [vmem:[%s1321_s24 + $0x10] sm:$0xff] %v401_v63  ;;  %567 = vst [vmem:[%s1321_s24 + $0x90] sm:$0xff] %v481_v0  ;;  %v416_v3 = vadd.f32 %v827_v1, %v1315_v48  ;;  %v496_v4 = vadd.f32 %v851_v2, %v1315_v48 }
 0x12a   : > { %v410_v5 = vpop.f32.mrf.mxu0  ;;  %v490_v6 = vpop.f32.mrf.mxu1 }
 0x12b   : > { %554 = vst [vmem:[%s1321_s24 + $0x28] sm:$0xff] %v416_v3  ;;  %570 = vst [vmem:[%s1321_s24 + $0xa8] sm:$0xff] %v496_v4  ;;  %v411_v7 = vadd.f32 %v1315_v48, %v410_v5  ;;  %v491_v8 = vadd.f32 %v1315_v48, %v490_v6 }
 0x12c   : > { %v830_v9 = vpop.f32.mrf.mxu0  ;;  %v854_v10 = vpop.f32.mrf.mxu1 }
 0x12d   : > { %553 = vst [vmem:[%s1321_s24 + $0x20] sm:$0xff] %v411_v7  ;;  %569 = vst [vmem:[%s1321_s24 + $0xa0] sm:$0xff] %v491_v8  ;;  %v426_v11 = vadd.f32 %v830_v9, %v1315_v48  ;;  %v506_v12 = vadd.f32 %v854_v10, %v1315_v48 }
 0x12e   : > { %v420_v13 = vpop.f32.mrf.mxu0  ;;  %v500_v14 = vpop.f32.mrf.mxu1 }
 0x12f   : > { %556 = vst [vmem:[%s1321_s24 + $0x38] sm:$0xff] %v426_v11  ;;  %572 = vst [vmem:[%s1321_s24 + $0xb8] sm:$0xff] %v506_v12  ;;  %v421_v15 = vadd.f32 %v1315_v48, %v420_v13  ;;  %v501_v16 = vadd.f32 %v1315_v48, %v500_v14 }
 0x130   : > { %v833_v17 = vpop.f32.mrf.mxu0  ;;  %v857_v18 = vpop.f32.mrf.mxu1 }
 0x131   : > { %555 = vst [vmem:[%s1321_s24 + $0x30] sm:$0xff] %v421_v15  ;;  %571 = vst [vmem:[%s1321_s24 + $0xb0] sm:$0xff] %v501_v16  ;;  %v436_v19 = vadd.f32 %v833_v17, %v1315_v48  ;;  %v516_v20 = vadd.f32 %v857_v18, %v1315_v48 }
 0x132   : > { %v430_v21 = vpop.f32.mrf.mxu0  ;;  %v510_v22 = vpop.f32.mrf.mxu1 }
 0x133   : > { %558 = vst [vmem:[%s1321_s24 + $0x48] sm:$0xff] %v436_v19  ;;  %574 = vst [vmem:[%s1321_s24 + $0xc8] sm:$0xff] %v516_v20  ;;  %v431_v23 = vadd.f32 %v1315_v48, %v430_v21  ;;  %v511_v24 = vadd.f32 %v1315_v48, %v510_v22 }
 0x134   : > { %v836_v25 = vpop.f32.mrf.mxu0  ;;  %v860_v26 = vpop.f32.mrf.mxu1 }
 0x135   : > { %557 = vst [vmem:[%s1321_s24 + $0x40] sm:$0xff] %v431_v23  ;;  %573 = vst [vmem:[%s1321_s24 + $0xc0] sm:$0xff] %v511_v24  ;;  %v446_v27 = vadd.f32 %v836_v25, %v1315_v48  ;;  %v526_v28 = vadd.f32 %v860_v26, %v1315_v48 }
 0x136   : > { %v440_v29 = vpop.f32.mrf.mxu0  ;;  %v520_v30 = vpop.f32.mrf.mxu1 }
 0x137   : > { %560 = vst [vmem:[%s1321_s24 + $0x58] sm:$0xff] %v446_v27  ;;  %576 = vst [vmem:[%s1321_s24 + $0xd8] sm:$0xff] %v526_v28  ;;  %v441_v31 = vadd.f32 %v1315_v48, %v440_v29  ;;  %v521_v32 = vadd.f32 %v1315_v48, %v520_v30 }
 0x138   : > { %v839_v33 = vpop.f32.mrf.mxu0  ;;  %v863_v34 = vpop.f32.mrf.mxu1 }
 0x139   : > { %559 = vst [vmem:[%s1321_s24 + $0x50] sm:$0xff] %v441_v31  ;;  %575 = vst [vmem:[%s1321_s24 + $0xd0] sm:$0xff] %v521_v32  ;;  %v456_v35 = vadd.f32 %v839_v33, %v1315_v48  ;;  %v536_v36 = vadd.f32 %v863_v34, %v1315_v48 }
 0x13a   : > { %v450_v37 = vpop.f32.mrf.mxu0  ;;  %v530_v38 = vpop.f32.mrf.mxu1 }
 0x13b   : > { %562 = vst [vmem:[%s1321_s24 + $0x68] sm:$0xff] %v456_v35  ;;  %578 = vst [vmem:[%s1321_s24 + $0xe8] sm:$0xff] %v536_v36  ;;  %v451_v39 = vadd.f32 %v1315_v48, %v450_v37  ;;  %v531_v40 = vadd.f32 %v1315_v48, %v530_v38 }
 0x13c   : > { %v842_v41 = vpop.f32.mrf.mxu0  ;;  %v866_v42 = vpop.f32.mrf.mxu1 }
 0x13d   : > { %561 = vst [vmem:[%s1321_s24 + $0x60] sm:$0xff] %v451_v39  ;;  %577 = vst [vmem:[%s1321_s24 + $0xe0] sm:$0xff] %v531_v40  ;;  %v466_v43 = vadd.f32 %v842_v41, %v1315_v48  ;;  %v546_v44 = vadd.f32 %v866_v42, %v1315_v48 }
 0x13e   : > { %v460_v45 = vpop.f32.mrf.mxu0  ;;  %v540_v46 = vpop.f32.mrf.mxu1 }
 0x13f   : > { %564 = vst [vmem:[%s1321_s24 + $0x78] sm:$0xff] %v466_v43  ;;  %580 = vst [vmem:[%s1321_s24 + $0xf8] sm:$0xff] %v546_v44  ;;  %v461_v47 = vadd.f32 %v1315_v48, %v460_v45  ;;  %v541_v49 = vadd.f32 %v1315_v48, %v540_v46 }
 0x141   : > { %563 = vst [vmem:[%s1321_s24 + $0x70] sm:$0xff] %v461_v47  ;;  %579 = vst [vmem:[%s1321_s24 + $0xf0] sm:$0xff] %v541_v49 }
 0x142   : > { %1043 = shalt.err (!%p1040_p5)
}
 0x143   : > { %s1044_s18 = scalar_lea.hbm %s1384_s21, 4096  ;;  %s1048_s27 = scalar_lea.hbm %s1443_s3, 8192 }
 0x144   : > { %p1045_p7 = scmp.ne.s32.totalorder %s1384_s21, %s1044_s18  ;;  %p1049_p9 = scmp.lt.s32.totalorder %s1384_s21, %s1443_s3 }
 0x145   : > { %p1050_p11 = scmp.lt.s32.totalorder %s1048_s27, %s1044_s18 }
 0x146   : > { %p1046_p4 = pnand %p1045_p7, %p1233_p13 }
 0x147   : > { %p1051_p10 = por %p1050_p11, %p1049_p9 }
 0x148   : > { %p1047_p6 = pneg %p1046_p4 }
 0x14a   : > { %p1052_p1 = pnand %p1051_p10, %p1047_p6 }
 0x14c   : > { %1055 = shalt.err (!%p1052_p1)
}
 0x14d   : > { %s1121_s24 = smov 128   ;;  %s1122_s30 = smov 8  }
 0x14e   : > { %905 = dma.vmem_to_hbm [thread:$0]  (%p1233_p13), %s1386_s29, 4096, %s1384_s21, %s582_s15, %s1121_s24, %s1121_s24, %s1122_s30  }
 0x14f PF: > { %s613_s5 = sand.u32 1, %s1094_s12   ;;  %p1459_p8 = scmp.ne.s32.totalorder %s1450_s23, 0 }
 0x150   : > { %p1460_p12 = scmp.ge.s32.totalorder %s1114_s17, 2  ;;  %s614_s6 = scalar_lea.sflag [#allocation4], %s613_s5 }
 0x152   : > { %p916_p0 = pnand %p1460_p12, %p1459_p8 }
 0x154   : > { %p917_p2 = pneg %p916_p0 }
 0x156   : > { %1089 = dma.done.wait (%p917_p2), %s614_s6, 4096  }
 0x157   : > { %1091 = vsyncadd (%p917_p2), %s614_s6, 4294963200  ;;  %s20_s17 = sadd.s32 1, %s1114_s17   ;;  %s1461_s12 = smov %s1098_s13 }
 0x158   : > { %p17_p3 = scmp.ge.s32.totalorder %s20_s17, 4   ;;  %s1462_s13 = smov %s1102_s14 }
 0x159   : > { %s1463_s14 = smov %s1242_s19  ;;  %s1464_s15 = smov %s1110_s16 }
 0x15a   : > { %s1465_s16 = smov %s1467_s28  ;;  %19 = sbr.rel (!%p17_p3) target bundleno = 7 (0x7), region = 85 }
 0x15f   :  { %619 = vsyncpa [#allocation3], 1 }
 0x160   :  { %621 = vsyncpa [#allocation3 + $0x1], 1 }
 0x161   :  { %622 = vsyncpa [#allocation6], 1 }
 0x162   :  { %623 = vsyncpa [#allocation4], 1 }
 0x163   :  { %625 = vsyncpa [#allocation4 + $0x1], 1 }

</bundles_post_ra>
